<compile_context>
chip_gen: v5e
topology: v5e:2x2
jax: 0.10.0
libtpu: 0.0.40
codegen_flags: <defaults>
</compile_context>

<pallas_src>
import jax
import jax.numpy as jnp
from jax.experimental import pallas as pl
from jax.experimental.pallas import tpu as pltpu

RMS_EPS = 1e-6


def _round_up(x, m):
    return (x + m - 1) // m * m


def _physical_vmem_bytes():
    """Best-effort query of per-core VMEM; falls back to 128 MiB (v5e/v6e)."""
    try:
        info = pltpu.get_tpu_info()
        for attr in ("vmem_capacity_bytes", "vmem_size_bytes", "vmem_bytes"):
            v = getattr(info, attr, None)
            if v:
                return int(v)
    except Exception:
        pass
    return 128 * 1024 * 1024


def _vmem_usage(tm, tn, H, x_item, w_item, w_buffers):
    return (
        2 * tm * H * x_item        # activation row tile, double buffered
        + w_buffers * tn * H * w_item  # streamed weight tile
        + 2 * tm * tn * 4          # f32 logits tile, double buffered
        + 2 * H * 4                # gamma (negligible)
    )


def _choose_tn(V, tn_max):
    # Prefer a lane-dense vocab tile that divides V exactly: no per-call pad of
    # the (V, H) weight and no width slice of the f32 logits.
    candidates = [c for c in (512, 448, 384, 320, 256, 192, 128) if c <= max(tn_max, 128)]
    for c in candidates:
        if V % c == 0:
            return c, V
    # TODO(synk): for vocabs not divisible by 128, pad the weight once at model
    # load time instead of per call.
    Vp = _round_up(V, 128)
    for c in candidates:
        if Vp % c == 0:
            return c, Vp
    return 128, Vp


def _choose_tm(M, H, tn, x_item, w_item, budget, tm_max):
    # Largest row tile that fits the VMEM budget; bigger tm => fewer full-weight
    # re-streams => compute-bound. Multiple of 16 (bf16 sublane tile).
    tm_cap = max(16, min(tm_max, _round_up(M, 16)))
    cands = sorted(
        {tm_cap} | {c for c in (1024, 896, 768, 640, 512, 384, 256, 192, 128, 64, 32, 16)
                    if c <= tm_cap},
        reverse=True,
    )
    for tm in cands:
        if _vmem_usage(tm, tn, H, x_item, w_item, 2) <= budget:
            return tm
    return 16


def _norm_lmhead_kernel(x_ref, gamma_ref, w_ref, o_ref):
    # x_ref:     (tm, H)   hidden-state row tile (VMEM-resident across vocab tiles)
    # gamma_ref: (1, H)    RMSNorm weight
    # w_ref:     (tn, H)   lm_head weight rows (torch Linear (V, H) layout)
    # o_ref:     (tm, tn)  f32 logits tile
    #
    # RMSNorm is recomputed for every vocab tile: its VPU/XLU/EUP cost is <1% of
    # the (tm x tn x H) matmul and hides in otherwise-idle slots; avoiding the
    # xn scratch frees VMEM for a larger tm and removes the serial j==0 dep.
    x = x_ref[...].astype(jnp.float32)
    var = jnp.mean(x * x, axis=-1, keepdims=True)
    xn = x * jax.lax.rsqrt(var + RMS_EPS)
    xn = (xn * gamma_ref[...].astype(jnp.float32)).astype(w_ref.dtype)

    # NT contraction on H: MXU consumes the (tn, H) layout directly, so the
    # largest tensor is never transposed in HBM.
    o_ref[...] = jax.lax.dot_general(
        xn,
        w_ref[...],
        dimension_numbers=(((1,), (1,)), ((), ())),
        preferred_element_type=jnp.float32,
    )


def norm_lm_head(x2d, norm_weight, lm_head_weight, *, tm_max=1024, tn_max=512):
    """Fused RMSNorm(H) + Linear(H->V, no bias). Returns f32 logits [M, V]."""
    M, H = x2d.shape
    V, Hw = lm_head_weight.shape
    assert H == Hw, "lm_head weight must be (V, H)"

    x_item = x2d.dtype.itemsize
    w_item = lm_head_weight.dtype.itemsize

    phys_vmem = _physical_vmem_bytes()
    budget = int(phys_vmem * 0.65)  # leave headroom for the compiler

    tn, Vp = _choose_tn(V, tn_max)
    tm = _choose_tm(M, H, tn, x_item, w_item, budget, tm_max)
    Mp = _round_up(M, tm)

    # Deeper buffering on the streamed weight only when VMEM (not small M)
    # capped tm below the compute/bandwidth balance point.
    w_buffers = 2
    if M >= 512 and tm < 512 and _vmem_usage(tm, tn, H, x_item, w_item, 3) <= budget:
        w_buffers = 3

    if Mp != M:
        x2d = jnp.pad(x2d, ((0, Mp - M), (0, 0)))
    w = lm_head_weight
    if Vp != V:
        w = jnp.pad(w, ((0, Vp - V), (0, 0)))
    gamma = norm_weight.reshape(1, H)

    grid = (Mp // tm, Vp // tn)  # vocab innermost -> x row tile stays resident

    usage = _vmem_usage(tm, tn, H, x_item, w_item, w_buffers)
    vmem_limit = min(int(phys_vmem * 0.85), max(usage + (8 << 20), 32 << 20))

    n_row_tiles = Mp // tm
    cost = pl.CostEstimate(
        flops=2 * Mp * H * Vp,
        transcendentals=Mp * (Vp // tn),  # rsqrt recomputed per vocab tile
        bytes_accessed=(
            Mp * H * x_item                 # activations streamed once
            + n_row_tiles * Vp * H * w_item  # full weight re-streamed per row tile
            + Mp * Vp * 4                    # f32 logits writeback
        ),
    )

    if w_buffers > 2:
        w_spec = pl.BlockSpec((tn, H), lambda i, j: (j, 0),
                              pipeline_mode=pl.Buffered(w_buffers))
    else:
        w_spec = pl.BlockSpec((tn, H), lambda i, j: (j, 0))

    out = pl.pallas_call(
        _norm_lmhead_kernel,
        out_shape=jax.ShapeDtypeStruct((Mp, Vp), jnp.float32),
        grid_spec=pltpu.PrefetchScalarGridSpec(
            num_scalar_prefetch=0,
            grid=grid,
            in_specs=[
                # activation row tile: same block for every vocab tile j
                pl.BlockSpec((tm, H), lambda i, j: (i, 0)),
                # RMSNorm gamma (tiny, broadcast)
                pl.BlockSpec((1, H), lambda i, j: (0, 0)),
                # lm_head rows for this vocab tile (streamed operand)
                w_spec,
            ],
            out_specs=pl.BlockSpec((tm, tn), lambda i, j: (i, j)),
        ),
        compiler_params=pltpu.CompilerParams(
            dimension_semantics=("parallel", "parallel"),
            vmem_limit_bytes=vmem_limit,
        ),
        cost_estimate=cost,
    )(x2d, gamma, w)

    if Mp != M or Vp != V:
        out = out[:M, :V]
    return out


def language_model_final_wrapper(inputs, norm_weight, lm_head_weight):
    """Mirrors LanguageModelFinalWrapper.forward(inputs).

    inputs = (hidden_states [B,S,H], attention_mask [B,S] or None, _, labels [B,S])
    returns (shift_logits, shift_labels)
    """
    hidden_states, attention_mask, _, labels = inputs
    B, S, H = hidden_states.shape
    V = lm_head_weight.shape[0]

    # Drop the last token BEFORE the projection (equivalent to the reference's
    # logits[..., :-1, :] but saves 1/S of the matmul + f32 writeback).
    hs = hidden_states[:, : S - 1, :].reshape(B * (S - 1), H)
    # Stream activations in the matmul input dtype (halves x DMA + VMEM when
    # lm_head is bf16); the RMSNorm math still runs in f32 inside the kernel.
    hs = hs.astype(lm_head_weight.dtype)

    logits = norm_lm_head(hs, norm_weight, lm_head_weight)  # f32 (== .float())
    logits = logits.reshape(B, S - 1, V)

    # TODO(synk): if this feeds cross-entropy, fuse logsumexp + label gather
    # into the vocab loop instead of materializing M*V f32 logits.

    shift_labels_full = labels[..., 1:]
    if attention_mask is not None:
        sel = attention_mask[..., 1:] != 0
        # TODO(synk): data-dependent boolean selection (variable-length output)
        # has no jit/Pallas equivalent; done eagerly in JAX like torch's
        # boolean advanced indexing.
        shift_logits = logits[sel]
        shift_labels = shift_labels_full[sel]
    else:
        shift_logits = logits
        shift_labels = shift_labels_full
    return shift_logits, shift_labels


if __name__ == "__main__":
    # Small deterministic example shapes
    B, S, H, V = 2, 8, 32, 128

    key = jax.random.PRNGKey(0)
    k_hs, k_w, k_lbl, k_mask = jax.random.split(key, 4)

    hidden_states = jax.random.normal(k_hs, (B, S, H), dtype=jnp.float32)
    labels = jax.random.randint(k_lbl, (B, S), 0, V, dtype=jnp.int32)
    # attention mask with some zeros (padding) to exercise the masked path
    attention_mask = (jax.random.uniform(k_mask, (B, S)) > 0.25).astype(jnp.int32)

    # Deterministic parameter init (RMSNorm weight = ones, lm_head ~ N(0, 0.02))
    norm_weight = jnp.ones((H,), dtype=jnp.float32)
    lm_head_weight = 0.02 * jax.random.normal(k_w, (V, H), dtype=jnp.float32)

    inputs = (hidden_states, attention_mask, None, labels)
    shift_logits, shift_labels = language_model_final_wrapper(
        inputs, norm_weight, lm_head_weight
    )
    jax.block_until_ready(shift_logits)
    jax.block_until_ready(shift_labels)

    # ---- f32 correctness check against a pure-JAX reference ----
    x = hidden_states[:, :-1, :].astype(jnp.float32)
    var = jnp.mean(x * x, axis=-1, keepdims=True)
    xn = x * jax.lax.rsqrt(var + RMS_EPS) * norm_weight.astype(jnp.float32)
    ref_logits = jnp.einsum("bsh,vh->bsv", xn, lm_head_weight.astype(jnp.float32))
    sel = attention_mask[..., 1:] != 0
    ref_shift_logits = ref_logits[sel]
    ref_shift_labels = labels[..., 1:][sel]

    n_keep = int(jnp.sum(sel))
    assert shift_logits.shape == (n_keep, V)
    assert shift_labels.shape == (n_keep,)
    assert shift_logits.dtype == jnp.float32
    assert bool(jnp.all(shift_labels == ref_shift_labels))
    assert bool(
        jnp.allclose(shift_logits, ref_shift_logits, rtol=1e-3, atol=1e-3)
    ), "f32 logits mismatch vs reference"

    # ---- bf16 weight path: compare against a matching mixed-precision ref ----
    lm_head_bf16 = lm_head_weight.astype(jnp.bfloat16)
    hs_bf16 = hidden_states[:, :-1, :].reshape(-1, H).astype(jnp.bfloat16)
    logits_bf16 = norm_lm_head(hs_bf16, norm_weight, lm_head_bf16)
    jax.block_until_ready(logits_bf16)

    xb = hs_bf16.astype(jnp.float32)
    var_b = jnp.mean(xb * xb, axis=-1, keepdims=True)
    xn_b = (xb * jax.lax.rsqrt(var_b + RMS_EPS) * norm_weight).astype(jnp.bfloat16)
    ref_b = jax.lax.dot_general(
        xn_b, lm_head_bf16,
        dimension_numbers=(((1,), (1,)), ((), ())),
        preferred_element_type=jnp.float32,
    )
    assert logits_bf16.dtype == jnp.float32
    assert bool(
        jnp.allclose(logits_bf16, ref_b, rtol=2e-2, atol=2e-2)
    ), "bf16 logits mismatch vs mixed-precision reference"

    print("KERNEL_OK")
</pallas_src>

<mosaic_0001>
module attributes {stable_mosaic.version = 11 : i64} {
  func.func @_norm_lmhead_kernel(%arg0: i32, %arg1: i32, %arg2: memref<16x32xf32, #tpu.memory_space<vmem>>, %arg3: memref<1x32xf32, #tpu.memory_space<vmem>>, %arg4: memref<128x32xf32, #tpu.memory_space<vmem>>, %arg5: memref<16x128xf32, #tpu.memory_space<vmem>>) attributes {dimension_semantics = [#tpu.dimension_semantics<parallel>, #tpu.dimension_semantics<parallel>], iteration_bounds = array<i64: 1, 1>, scalar_prefetch = 0 : i64, scratch_operands = 0 : i64, tpu.core_type = #tpu.core_type<tc>, window_params = [{transform_indices = @transform_0, window_bounds = array<i64: 16, 32>}, {pipeline_mode = #tpu.pipeline_mode<synchronous>, transform_indices = @transform_1, window_bounds = array<i64: 1, 32>}, {transform_indices = @transform_2, window_bounds = array<i64: 128, 32>}, {transform_indices = @transform_3, window_bounds = array<i64: 16, 128>}]} {
    %c0 = arith.constant 0 : index
    %c0_0 = arith.constant 0 : index
    %0 = vector.load %arg2[%c0, %c0_0] : memref<16x32xf32, #tpu.memory_space<vmem>>, vector<16x32xf32>
    %1 = arith.mulf %0, %0 : vector<16x32xf32>
    %cst = arith.constant dense<0.000000e+00> : vector<16xf32>
    %2 = vector.multi_reduction <add>, %1, %cst [1] : vector<16x32xf32> to vector<16xf32>
    %3 = vector.shape_cast %2 : vector<16xf32> to vector<16x1xf32>
    %cst_1 = arith.constant 3.200000e+01 : f32
    %4 = vector.broadcast %cst_1 : f32 to vector<16x1xf32>
    %5 = arith.divf %3, %4 : vector<16x1xf32>
    %cst_2 = arith.constant 9.99999997E-7 : f32
    %6 = vector.broadcast %cst_2 : f32 to vector<16x1xf32>
    %7 = arith.addf %5, %6 : vector<16x1xf32>
    %8 = math.rsqrt %7 : vector<16x1xf32>
    %9 = vector.broadcast %8 : vector<16x1xf32> to vector<16x32xf32>
    %10 = arith.mulf %0, %9 : vector<16x32xf32>
    %c0_3 = arith.constant 0 : index
    %c0_4 = arith.constant 0 : index
    %11 = vector.load %arg3[%c0_3, %c0_4] : memref<1x32xf32, #tpu.memory_space<vmem>>, vector<1x32xf32>
    %12 = vector.broadcast %11 : vector<1x32xf32> to vector<16x32xf32>
    %13 = arith.mulf %10, %12 : vector<16x32xf32>
    %c0_5 = arith.constant 0 : index
    %c0_6 = arith.constant 0 : index
    %14 = vector.load %arg4[%c0_5, %c0_6] : memref<128x32xf32, #tpu.memory_space<vmem>>, vector<128x32xf32>
    %cst_7 = arith.constant dense<0.000000e+00> : vector<16x128xf32>
    %15 = tpu.matmul %13, %14, %cst_7 {dimension_numbers = #tpu.dot_dimension_numbers<[1], [1], [0], [0], [0, 0, 1, 0], [], []>} : vector<16x32xf32>, vector<128x32xf32>, vector<16x128xf32> -> vector<16x128xf32>
    %c0_8 = arith.constant 0 : index
    %c0_9 = arith.constant 0 : index
    %16 = vector.load %arg5[%c0_8, %c0_9] : memref<16x128xf32, #tpu.memory_space<vmem>>, vector<16x128xf32>
    tpu.vector_store %arg5[%c0_8, %c0_9], %15 {strides = array<i32>} : memref<16x128xf32, #tpu.memory_space<vmem>>, vector<16x128xf32>,
    return
  }
  func.func @transform_0(%arg0: i32, %arg1: i32) -> (i32, i32) {
    %c0_i32 = arith.constant 0 : i32
    %c0_i32_0 = arith.constant 0 : i32
    return %arg0, %c0_i32 : i32, i32
  }
  func.func @transform_1(%arg0: i32, %arg1: i32) -> (i32, i32) {
    %c0_i32 = arith.constant 0 : i32
    %c0_i32_0 = arith.constant 0 : i32
    %c0_i32_1 = arith.constant 0 : i32
    return %c0_i32, %c0_i32_0 : i32, i32
  }
  func.func @transform_2(%arg0: i32, %arg1: i32) -> (i32, i32) {
    %c0_i32 = arith.constant 0 : i32
    %c0_i32_0 = arith.constant 0 : i32
    return %arg1, %c0_i32 : i32, i32
  }
  func.func @transform_3(%arg0: i32, %arg1: i32) -> (i32, i32) {
    %c0_i32 = arith.constant 0 : i32
    return %arg0, %arg1 : i32, i32
  }
}

</mosaic_0001>

<bundles_post_ra>
// kernel: tpu_custom_call.1
= control target key start
LH: loop header
LB: loop body
LE: loop exit
PB: predicated region body
PF: predicated region fallthrough
CT: control target
= control target key end

     0   :  { %vm19_vm0 = vcmask 261120   ;;  %s379_s0 = inlined_call_operand.vmem [shape: f32[16,32], index: 0, kind: input, shape index: {}]   ;;  %s380_s1 = inlined_call_operand.vmem [shape: f32[1,32], index: 1, kind: input, shape index: {}]   ;;  %s381_s2 = inlined_call_operand.vmem [shape: f32[128,32], index: 2, kind: input, shape index: {}]   ;;  %s382_s3 = inlined_call_operand.hbm [shape: f32[16,128], index: 3, kind: output, shape index: {}]  }
   0x1   :  { %v276_v0 = vld [vmem:[%s379_s0] sm:$0xff]  ;;  %v80_v1 = vld [vmem:[%s381_s2 + $0x78] sm:$0xff]  ;;  %v288_v3 = vld [vmem:[%s379_s0 + $0x8] sm:$0xff] }
   0x2   :  { %v17_v2 = vmul.f32 %v276_v0, %v276_v0  ;;  %178 = vmatpush.xpose.msk.msra.mxu0 %vm19_vm0, %v80_v1  ;;  %196 = vmatpush.xpose.msk.msra.mxu1 %vm19_vm0, %v80_v1  ;;  %v79_v4 = vld [vmem:[%s381_s2 + $0x70] sm:$0xff] }
   0x4   :  { %v20_v5 = vsel %vm19_vm0, %v17_v2, 0.0 }
   0x5   :  { %21 = vadd.xlane.f32.xlu0 %v20_v5 }
   0x6   :  { %8 = vsyncpa [#allocation3], 0  ;;  %v18_v6 = vmul.f32 %v288_v3, %v288_v3  ;;  %179 = vmatpush.xpose.msk.msra.mxu0 %vm19_vm0, %v79_v4  ;;  %197 = vmatpush.xpose.msk.msra.mxu1 %vm19_vm0, %v79_v4  ;;  %v78_v7 = vld [vmem:[%s381_s2 + $0x68] sm:$0xff]  ;;  %v77_v9 = vld [vmem:[%s381_s2 + $0x60] sm:$0xff]  ;;  %v249_v17 = vmov 32.0   ;;  %s166_s23 = sshll.u32 %s382_s3, 4  ;;  %s167_s23 = int_to_ptr.hbm [resolvable:$true] %s166_s23 }
   0x7   :  { %v76_v10 = vld [vmem:[%s381_s2 + $0x58] sm:$0xff]  ;;  %v75_v11 = vld [vmem:[%s381_s2 + $0x50] sm:$0xff]  ;;  %v74_v12 = vld [vmem:[%s381_s2 + $0x48] sm:$0xff]  ;;  %217 = vrcp.f32 %v249_v17  ;;  %s251_s24 = smov 128   ;;  %s252_s25 = smov 8  }
   0x8   :  { %v23_v8 = vsel %vm19_vm0, %v18_v6, 0.0  ;;  %v73_v13 = vld [vmem:[%s381_s2 + $0x40] sm:$0xff]  ;;  %v72_v14 = vld [vmem:[%s381_s2 + $0x38] sm:$0xff]  ;;  %v71_v15 = vld [vmem:[%s381_s2 + $0x30] sm:$0xff] }
   0x9   :  { %v70_v16 = vld [vmem:[%s381_s2 + $0x28] sm:$0xff]  ;;  %v69_v18 = vld [vmem:[%s381_s2 + $0x20] sm:$0xff]  ;;  %v68_v20 = vld [vmem:[%s381_s2 + $0x18] sm:$0xff] }
   0xa   :  { %180 = vmatpush.xpose.msk.msra.mxu0 %vm19_vm0, %v78_v7  ;;  %198 = vmatpush.xpose.msk.msra.mxu1 %vm19_vm0, %v78_v7  ;;  %v67_v22 = vld [vmem:[%s381_s2 + $0x10] sm:$0xff]  ;;  %v66_v24 = vld [vmem:[%s381_s2 + $0x8] sm:$0xff]  ;;  %v65_v26 = vld [vmem:[%s381_s2] sm:$0xff] }
   0xb   :  { %v216_v43 = vld [vmem:[%s380_s1] ss:$0 sm:$0xff]  ;;  %s250_s1 = smov [#allocation2]  }
   0xc   :  { %s164_s21 = sshll.u32 %s250_s1, 4  ;;  %s165_s21 = int_to_ptr.vmem [resolvable:$true] %s164_s21 }
   0xd   :  { %24 = vadd.xlane.f32.xlu0 %v23_v8  ;;  %v218_v19 = vpop.eup %217 }
   0xe   :  { %181 = vmatpush.xpose.msk.msra.mxu0 %vm19_vm0, %v77_v9  ;;  %199 = vmatpush.xpose.msk.msra.mxu1 %vm19_vm0, %v77_v9  ;;  %v27_v21 = vmul.f32 32.0, %v218_v19  ;;  %vm31_vm1 = vweird.f32 %v218_v19 }
  0x10   :  { %v28_v23 = vsub.f32 1.0, %v27_v21 }
  0x12   :  { %182 = vmatpush.xpose.msk.msra.mxu0 %vm19_vm0, %v76_v10  ;;  %200 = vmatpush.xpose.msk.msra.mxu1 %vm19_vm0, %v76_v10  ;;  %v29_v25 = vmul.f32 %v218_v19, %v28_v23 }
  0x14   :  { %v30_v27 = vadd.f32 %v218_v19, %v29_v25 }
  0x16   :  { %183 = vmatpush.xpose.msk.msra.mxu0 %vm19_vm0, %v75_v11  ;;  %201 = vmatpush.xpose.msk.msra.mxu1 %vm19_vm0, %v75_v11  ;;  %v32_v28 = vsel %vm31_vm1, %v218_v19, %v30_v27 }
  0x1a   :  { %184 = vmatpush.xpose.msk.msra.mxu0 %vm19_vm0, %v74_v12  ;;  %202 = vmatpush.xpose.msk.msra.mxu1 %vm19_vm0, %v74_v12 }
  0x1e   :  { %185 = vmatpush.xpose.msk.msra.mxu0 %vm19_vm0, %v73_v13  ;;  %203 = vmatpush.xpose.msk.msra.mxu1 %vm19_vm0, %v73_v13 }
  0x22   :  { %186 = vmatpush.xpose.msk.msra.mxu0 %vm19_vm0, %v72_v14  ;;  %204 = vmatpush.xpose.msk.msra.mxu1 %vm19_vm0, %v72_v14 }
  0x26   :  { %187 = vmatpush.xpose.msk.msra.mxu0 %vm19_vm0, %v71_v15  ;;  %205 = vmatpush.xpose.msk.msra.mxu1 %vm19_vm0, %v71_v15 }
  0x2a   :  { %188 = vmatpush.xpose.msk.msra.mxu0 %vm19_vm0, %v70_v16  ;;  %206 = vmatpush.xpose.msk.msra.mxu1 %vm19_vm0, %v70_v16 }
  0x2e   :  { %189 = vmatpush.xpose.msk.msra.mxu0 %vm19_vm0, %v69_v18  ;;  %207 = vmatpush.xpose.msk.msra.mxu1 %vm19_vm0, %v69_v18 }
  0x32   :  { %190 = vmatpush.xpose.msk.msra.mxu0 %vm19_vm0, %v68_v20  ;;  %208 = vmatpush.xpose.msk.msra.mxu1 %vm19_vm0, %v68_v20 }
  0x36   :  { %191 = vmatpush.xpose.msk.msra.mxu0 %vm19_vm0, %v67_v22  ;;  %209 = vmatpush.xpose.msk.msra.mxu1 %vm19_vm0, %v67_v22 }
  0x3a   :  { %192 = vmatpush.xpose.msk.msra.mxu0 %vm19_vm0, %v66_v24  ;;  %210 = vmatpush.xpose.msk.msra.mxu1 %vm19_vm0, %v66_v24 }
  0x3e   :  { %193 = vmatpush.xpose.msk.msra.mxu0 %vm19_vm0, %v65_v26  ;;  %211 = vmatpush.xpose.msk.msra.mxu1 %vm19_vm0, %v65_v26 }
  0x78   :  { %v22_v29 = vpop.xlane.xlu0 %21 }
  0x79   :  { %v33_v30 = vmul.f32 %v32_v28, %v22_v29 }
  0x7b   :  { %v35_v31 = vadd.f32 1e-06, %v33_v30 }
  0x7d   :  { %219 = vrsqrt.f32 %v35_v31  ;;  %vm43_vm3 = vweird.f32 %v35_v31 }
  0x80   :  { %v25_v32 = vpop.xlane.xlu0 %24 }
  0x81   :  { %v34_v33 = vmul.f32 %v32_v28, %v25_v32 }
  0x83   :  { %v220_v34 = vpop.eup %219  ;;  %v36_v35 = vadd.f32 1e-06, %v34_v33 }
  0x84   :  { %v38_v36 = vmul.f32 %v220_v34, %v35_v31  ;;  %vm44_vm2 = vweird.f32 %v220_v34 }
  0x85   :  { %221 = vrsqrt.f32 %v36_v35  ;;  %vm45_vm4 = vmor %vm43_vm3, %vm44_vm2  ;;  %vm53_vm6 = vweird.f32 %v36_v35 }
  0x86   :  { %v39_v37 = vmul.f32 %v220_v34, %v38_v36 }
  0x88   :  { %v40_v38 = vmul.f32 0.5, %v39_v37 }
  0x8a   :  { %v41_v39 = vsub.f32 1.5, %v40_v38 }
  0x8b   :  { %v222_v40 = vpop.eup %221 }
  0x8c   :  { %v42_v41 = vmul.f32 %v220_v34, %v41_v39  ;;  %v48_v42 = vmul.f32 %v222_v40, %v36_v35  ;;  %vm54_vm5 = vweird.f32 %v222_v40 }
  0x8d   :  { %vm55_vm7 = vmor %vm53_vm6, %vm54_vm5 }
  0x8e   :  { %v49_v44 = vmul.f32 %v222_v40, %v48_v42  ;;  %v46_v45 = vsel %vm45_vm4, %v220_v34, %v42_v41 }
  0x8f   :  { %v57_v46 = vmul.f32 %v46_v45, %v276_v0 }
  0x90   :  { %v50_v47 = vmul.f32 0.5, %v49_v44 }
  0x91   :  { %v63_v48 = vmul.f32 %v216_v43, %v57_v46 }
  0x92   :  { %v51_v49 = vsub.f32 1.5, %v50_v47 }
  0x93   :  { %194 = vmatmul.msk.f32.vlgmr.msra.gmra.mxu0 %vm19_vm0, %v63_v48 }
  0x94   :  { %v52_v50 = vmul.f32 %v222_v40, %v51_v49 }
  0x96   :  { %v56_v51 = vsel %vm55_vm7, %v222_v40, %v52_v50 }
  0x97   :  { %v58_v52 = vmul.f32 %v56_v51, %v288_v3 }
  0x99   :  { %v64_v53 = vmul.f32 %v216_v43, %v58_v52 }
  0x9b   :  { %195 = vmatmul.msk.f32.vlgmr.msra.gmra.mxu1 %vm19_vm0, %v64_v53 }
 0x110   :  { %v152_v54 = vpop.f32.mrf.mxu0 }
 0x111   :  { %158 = vst [vmem:[#allocation2] sm:$0xff] %v152_v54 }
 0x118   :  { %v155_v55 = vpop.f32.mrf.mxu1 }
 0x119   :  { %159 = vst [vmem:[#allocation2 + $0x8] sm:$0xff] %v155_v55 }
 0x11a   :  { %172 = dma.vmem_to_hbm [thread:$0]  %s165_s21, 256, %s167_s23, [#allocation3], %s251_s24, %s251_s24, %s252_s25  }
 0x11b   :  { %247 = dma.done.wait [#allocation3], 256  }
 0x11c   :  { %248 = vsyncadd [#allocation3], 4294967040 }
 0x11d   :  { %177 = vsyncpa [#allocation3], 1 }

</bundles_post_ra>
